<compile_context>
chip_gen: v7x
topology: tpu7x:2x2x1
jax: 0.10.0
libtpu: 0.0.40
codegen_flags: <defaults>
</compile_context>

<pallas_src>
import functools

import jax
import jax.numpy as jnp
from jax.experimental import pallas as pl
from jax.experimental.pallas import tpu as pltpu


def _cross_loss_kernel(logits_ref, target_ref, probs_ref, out_ref,
                       *, r, n_valid, block_n, tiles_per_core):
    """Processes one lane-dense (C, block_n) tile of the batch."""
    core = pl.program_id(0)      # "parallel" axis (megacore split on v7x)
    step = pl.program_id(1)      # "arbitrary" reduction axis over batch tiles

    logits = logits_ref[...].astype(jnp.float32)          # (C, TN)
    targets = target_ref[...]                             # (1, TN) int32
    probs = probs_ref[...].astype(jnp.float32)            # (1, TN)
    c = logits.shape[0]

    # Global batch index of each lane in this tile; mask out the padded tail.
    tile = core * tiles_per_core + step
    lane = jax.lax.broadcasted_iota(jnp.int32, (1, block_n), 1)
    valid = (tile * block_n + lane) < n_valid              # (1, TN)

    # ---- cross entropy (numerically stable log-softmax over classes) ----
    m = jnp.max(logits, axis=0, keepdims=True)                        # (1, TN)
    lse = m + jnp.log(jnp.sum(jnp.exp(logits - m), axis=0, keepdims=True))
    row_ids = jax.lax.broadcasted_iota(jnp.int32, (c, block_n), 0)    # (C, TN)
    # NOTE: assumes targets in [0, C) (same as torch for valid inputs).
    tgt_logit = jnp.sum(jnp.where(row_ids == targets, logits, 0.0),
                        axis=0, keepdims=True)                        # (1, TN)
    ce = jnp.where(valid, lse - tgt_logit, 0.0)
    loss1_part = jnp.sum(ce) * (1.0 / n_valid)    # mean over the *true* batch

    # ---- r * sum_i (final_out[i, 0] - probs[i])^2 ----
    # In the transposed layout the class-0 logits are a dense lane row.
    diff = logits[0:1, :] - probs                                     # (1, TN)
    loss2_part = r * jnp.sum(jnp.where(valid, diff * diff, 0.0))

    @pl.when(step == 0)
    def _():
        out_ref[...] = jnp.zeros_like(out_ref)
    # Broadcast-add the scalar partial into this core's output block.
    out_ref[...] += loss1_part + loss2_part


def my_cross_loss(final_out, point_victor, probs, r, *, block_n=None,
                  num_cores=2):
    """final_out: (N, C) logits; point_victor: (N,) int; probs: (N,) float."""
    n, c = final_out.shape

    # Don't spread tiny batches across cores / extra grid steps.
    num_cores = max(1, min(num_cores, pl.cdiv(n, 128)))

    if block_n is None:
        # ~2 MiB of f32 working set per logits block (x2 double buffering)
        # stays well inside 32 MiB scoped VMEM on v6e/v7x (16 MiB on v5e).
        block_n = (2 * 1024 * 1024) // max(1, c * 4)
        block_n = max(128, min(8192, block_n))
        # Don't over-tile tiny batches.
        block_n = min(block_n, pl.cdiv(pl.cdiv(n, num_cores), 128) * 128)
    block_n = max(128, (block_n // 128) * 128)

    tiles_per_core = pl.cdiv(n, block_n * num_cores)
    n_pad = num_cores * tiles_per_core * block_n

    # Lane-dense (C, N) layout (classes on sublanes, batch on lanes), padded
    # to the grid extent; padded columns are masked in-kernel.  The original
    # dtype is preserved (bf16 stays bf16) -> cast to f32 inside the kernel.
    logits_t = final_out.T
    targets_row = point_victor.astype(jnp.int32).reshape(1, n)
    probs_row = probs.reshape(1, n)
    if n_pad != n:
        pad = ((0, 0), (0, n_pad - n))
        logits_t = jnp.pad(logits_t, pad)
        targets_row = jnp.pad(targets_row, pad)
        probs_row = jnp.pad(probs_row, pad)

    kernel = functools.partial(_cross_loss_kernel, r=float(r), n_valid=n,
                               block_n=block_n, tiles_per_core=tiles_per_core)
    idx = lambda core, step: (0, core * tiles_per_core + step)

    partials = pl.pallas_call(
        kernel,
        out_shape=jax.ShapeDtypeStruct((num_cores, 8, 128), jnp.float32),
        grid=(num_cores, tiles_per_core),
        in_specs=[
            pl.BlockSpec((c, block_n), idx),
            pl.BlockSpec((1, block_n), idx),
            pl.BlockSpec((1, block_n), idx),
        ],
        out_specs=pl.BlockSpec((1, 8, 128), lambda core, step: (core, 0, 0)),
        compiler_params=pltpu.CompilerParams(
            dimension_semantics=("parallel", "arbitrary")),
    )(logits_t, targets_row, probs_row)

    return jnp.sum(partials[:, 0, 0])


def _reference(final_out, point_victor, probs, r):
    # Plain-JAX reference mirroring the torch semantics.
    logits = final_out.astype(jnp.float32)
    logp = jax.nn.log_softmax(logits, axis=-1)
    loss1 = -jnp.mean(jnp.take_along_axis(
        logp, point_victor.astype(jnp.int32)[:, None], axis=-1))
    loss2 = r * jnp.sum((logits[:, 0] - probs.astype(jnp.float32)) ** 2)
    return loss1 + loss2


if __name__ == "__main__":
    r = 0.5
    key = jax.random.PRNGKey(0)
    k1, k2, k3, k4, k5, k6 = jax.random.split(key, 6)

    # Small case matching the module's typical use.
    N, C = 8, 4
    final_out = jax.random.normal(k1, (N, C), dtype=jnp.float32)
    point_victor = jax.random.randint(k2, (N,), 0, C, dtype=jnp.int32)
    probs = jax.random.uniform(k3, (N,), dtype=jnp.float32)

    loss = my_cross_loss(final_out, point_victor, probs, r)
    jax.block_until_ready(loss)
    ref = _reference(final_out, point_victor, probs, r)
    assert jnp.allclose(loss, ref, rtol=1e-5, atol=1e-5), (loss, ref)

    # Larger multi-tile case with a ragged tail (N % tile != 0) and bf16
    # logits, exercising grid accumulation, megacore split, masking and the
    # in-kernel cast.
    N2, C2 = 700, 3
    final_out2 = jax.random.normal(k4, (N2, C2),
                                   dtype=jnp.float32).astype(jnp.bfloat16)
    point_victor2 = jax.random.randint(k5, (N2,), 0, C2, dtype=jnp.int32)
    probs2 = jax.random.uniform(k6, (N2,), dtype=jnp.float32)

    loss_b = my_cross_loss(final_out2, point_victor2, probs2, r, block_n=128)
    jax.block_until_ready(loss_b)
    ref_b = _reference(final_out2, point_victor2, probs2, r)
    assert jnp.allclose(loss_b, ref_b, rtol=1e-4, atol=1e-4), (loss_b, ref_b)

    print("KERNEL_OK")
</pallas_src>

<mosaic_0001>
module attributes {stable_mosaic.version = 11 : i64} {
  func.func @_cross_loss_kernel(%arg0: i32, %arg1: i32, %arg2: memref<4x128xf32, #tpu.memory_space<vmem>>, %arg3: memref<1x128xi32, #tpu.memory_space<vmem>>, %arg4: memref<1x128xf32, #tpu.memory_space<vmem>>, %arg5: memref<1x8x128xf32, #tpu.memory_space<vmem>>) attributes {dimension_semantics = [#tpu.dimension_semantics<parallel>, #tpu.dimension_semantics<arbitrary>], iteration_bounds = array<i64: 1, 1>, scalar_prefetch = 0 : i64, scratch_operands = 0 : i64, tpu.core_type = #tpu.core_type<tc>, window_params = [{transform_indices = @transform_0, window_bounds = array<i64: 4, 128>}, {transform_indices = @transform_1, window_bounds = array<i64: 1, 128>}, {transform_indices = @transform_2, window_bounds = array<i64: 1, 128>}, {transform_indices = @transform_3, window_bounds = array<i64: 1, 8, 128>}]} {
    %c0 = arith.constant 0 : index
    %c0_0 = arith.constant 0 : index
    %0 = vector.load %arg2[%c0, %c0_0] : memref<4x128xf32, #tpu.memory_space<vmem>>, vector<4x128xf32>
    %c0_1 = arith.constant 0 : index
    %c0_2 = arith.constant 0 : index
    %1 = vector.load %arg3[%c0_1, %c0_2] : memref<1x128xi32, #tpu.memory_space<vmem>>, vector<1x128xi32>
    %c0_3 = arith.constant 0 : index
    %c0_4 = arith.constant 0 : index
    %2 = vector.load %arg4[%c0_3, %c0_4] : memref<1x128xf32, #tpu.memory_space<vmem>>, vector<1x128xf32>
    %c1_i32 = arith.constant 1 : i32
    %3 = arith.muli %arg0, %c1_i32 : i32
    %4 = arith.addi %3, %arg1 : i32
    %5 = tpu.iota {dimensions = array<i32: 1>} : vector<1x128xi32>
    %c128_i32 = arith.constant 128 : i32
    %6 = arith.muli %4, %c128_i32 : i32
    %7 = vector.broadcast %6 : i32 to vector<1x128xi32>
    %8 = arith.addi %7, %5 : vector<1x128xi32>
    %c8_i32 = arith.constant 8 : i32
    %9 = vector.broadcast %c8_i32 : i32 to vector<1x128xi32>
    %10 = arith.cmpi slt, %8, %9 : vector<1x128xi32>
    %cst = arith.constant dense<0xFF800000> : vector<128xf32>
    %11 = vector.multi_reduction <maximumf>, %0, %cst [0] : vector<4x128xf32> to vector<128xf32>
    %12 = vector.shape_cast %11 : vector<128xf32> to vector<1x128xf32>
    %13 = vector.broadcast %12 : vector<1x128xf32> to vector<4x128xf32>
    %14 = arith.subf %0, %13 : vector<4x128xf32>
    %15 = math.exp %14 : vector<4x128xf32>
    %cst_5 = arith.constant dense<0.000000e+00> : vector<128xf32>
    %16 = vector.multi_reduction <add>, %15, %cst_5 [0] : vector<4x128xf32> to vector<128xf32>
    %17 = vector.shape_cast %16 : vector<128xf32> to vector<1x128xf32>
    %18 = math.log %17 : vector<1x128xf32>
    %19 = arith.addf %12, %18 : vector<1x128xf32>
    %20 = tpu.iota {dimensions = array<i32: 0>} : vector<4x128xi32>
    %21 = vector.broadcast %1 : vector<1x128xi32> to vector<4x128xi32>
    %22 = arith.cmpi eq, %20, %21 : vector<4x128xi32>
    %cst_6 = arith.constant 0.000000e+00 : f32
    %23 = vector.broadcast %cst_6 : f32 to vector<4x128xf32>
    %24 = arith.select %22, %0, %23 : vector<4x128xi1>, vector<4x128xf32>
    %cst_7 = arith.constant dense<0.000000e+00> : vector<128xf32>
    %25 = vector.multi_reduction <add>, %24, %cst_7 [0] : vector<4x128xf32> to vector<128xf32>
    %26 = vector.shape_cast %25 : vector<128xf32> to vector<1x128xf32>
    %27 = arith.subf %19, %26 : vector<1x128xf32>
    %cst_8 = arith.constant 0.000000e+00 : f32
    %28 = vector.broadcast %cst_8 : f32 to vector<1x128xf32>
    %29 = arith.select %10, %27, %28 : vector<1x128xi1>, vector<1x128xf32>
    %30 = vector.shape_cast %29 : vector<1x128xf32> to vector<1x1x128xf32>
    %cst_9 = arith.constant dense<0.000000e+00> : vector<1xf32>
    %31 = vector.multi_reduction <add>, %30, %cst_9 [1, 2] : vector<1x1x128xf32> to vector<1xf32>
    %32 = vector.shape_cast %31 : vector<1xf32> to vector<1x1x1xf32>
    %33 = vector.extract %32[0, 0, 0] : f32 from vector<1x1x1xf32>
    %cst_10 = arith.constant 1.250000e-01 : f32
    %34 = arith.mulf %33, %cst_10 : f32
    %35 = vector.extract_strided_slice %0 {offsets = [0, 0], sizes = [1, 128], strides = [1, 1]} : vector<4x128xf32> to vector<1x128xf32>
    %36 = arith.subf %35, %2 : vector<1x128xf32>
    %37 = arith.mulf %36, %36 : vector<1x128xf32>
    %cst_11 = arith.constant 0.000000e+00 : f32
    %38 = vector.broadcast %cst_11 : f32 to vector<1x128xf32>
    %39 = arith.select %10, %37, %38 : vector<1x128xi1>, vector<1x128xf32>
    %40 = vector.shape_cast %39 : vector<1x128xf32> to vector<1x1x128xf32>
    %cst_12 = arith.constant dense<0.000000e+00> : vector<1xf32>
    %41 = vector.multi_reduction <add>, %40, %cst_12 [1, 2] : vector<1x1x128xf32> to vector<1xf32>
    %42 = vector.shape_cast %41 : vector<1xf32> to vector<1x1x1xf32>
    %43 = vector.extract %42[0, 0, 0] : f32 from vector<1x1x1xf32>
    %cst_13 = arith.constant 5.000000e-01 : f32
    %44 = arith.mulf %cst_13, %43 : f32
    %c0_i32 = arith.constant 0 : i32
    %45 = arith.cmpi eq, %arg1, %c0_i32 : i32
    %46 = arith.extui %45 : i1 to i32
    %c0_i32_14 = arith.constant 0 : i32
    %47 = arith.cmpi ne, %46, %c0_i32_14 : i32
    scf.if %47 {
      %cst_21 = arith.constant 0.000000e+00 : f32
      %53 = vector.broadcast %cst_21 : f32 to vector<1x8x128xf32>
      %c0_22 = arith.constant 0 : index
      %c0_23 = arith.constant 0 : index
      %c0_24 = arith.constant 0 : index
      %54 = vector.load %arg5[%c0_22, %c0_23, %c0_24] : memref<1x8x128xf32, #tpu.memory_space<vmem>>, vector<1x8x128xf32>
      tpu.vector_store %arg5[%c0_22, %c0_23, %c0_24], %53 {strides = array<i32>} : memref<1x8x128xf32, #tpu.memory_space<vmem>>, vector<1x8x128xf32>,
    } else {
    }
    %c0_15 = arith.constant 0 : index
    %c0_16 = arith.constant 0 : index
    %c0_17 = arith.constant 0 : index
    %48 = vector.load %arg5[%c0_15, %c0_16, %c0_17] : memref<1x8x128xf32, #tpu.memory_space<vmem>>, vector<1x8x128xf32>
    %49 = arith.addf %34, %44 : f32
    %50 = vector.broadcast %49 : f32 to vector<1x8x128xf32>
    %51 = arith.addf %48, %50 : vector<1x8x128xf32>
    %c0_18 = arith.constant 0 : index
    %c0_19 = arith.constant 0 : index
    %c0_20 = arith.constant 0 : index
    %52 = vector.load %arg5[%c0_18, %c0_19, %c0_20] : memref<1x8x128xf32, #tpu.memory_space<vmem>>, vector<1x8x128xf32>
    tpu.vector_store %arg5[%c0_18, %c0_19, %c0_20], %51 {strides = array<i32>} : memref<1x8x128xf32, #tpu.memory_space<vmem>>, vector<1x8x128xf32>,
    return
  }
  func.func @transform_0(%arg0: i32, %arg1: i32) -> (i32, i32) {
    %c1_i32 = arith.constant 1 : i32
    %0 = arith.muli %arg0, %c1_i32 : i32
    %1 = arith.addi %0, %arg1 : i32
    %c0_i32 = arith.constant 0 : i32
    %c0_i32_0 = arith.constant 0 : i32
    return %c0_i32, %1 : i32, i32
  }
  func.func @transform_1(%arg0: i32, %arg1: i32) -> (i32, i32) {
    %c1_i32 = arith.constant 1 : i32
    %0 = arith.muli %arg0, %c1_i32 : i32
    %1 = arith.addi %0, %arg1 : i32
    %c0_i32 = arith.constant 0 : i32
    %c0_i32_0 = arith.constant 0 : i32
    return %c0_i32, %1 : i32, i32
  }
  func.func @transform_2(%arg0: i32, %arg1: i32) -> (i32, i32) {
    %c1_i32 = arith.constant 1 : i32
    %0 = arith.muli %arg0, %c1_i32 : i32
    %1 = arith.addi %0, %arg1 : i32
    %c0_i32 = arith.constant 0 : i32
    %c0_i32_0 = arith.constant 0 : i32
    return %c0_i32, %1 : i32, i32
  }
  func.func @transform_3(%arg0: i32, %arg1: i32) -> (i32, i32, i32) {
    %c0_i32 = arith.constant 0 : i32
    %c0_i32_0 = arith.constant 0 : i32
    %c0_i32_1 = arith.constant 0 : i32
    return %arg0, %c0_i32, %c0_i32_0 : i32, i32, i32
  }
}

</mosaic_0001>

<bundles_post_ra>
// kernel: tpu_custom_call.1
= control target key start
LH: loop header
LB: loop body
LE: loop exit
PB: predicated region body
PF: predicated region fallthrough
CT: control target
= control target key end

     0   :  { %8 = vsyncpa [#allocation3], 0  ;;  %s279_s0 = inlined_call_operand.hbm [shape: f32[4,128], index: 0, kind: input, shape index: {}]   ;;  %s280_s1 = inlined_call_operand.vmem [shape: s32[1,128], index: 1, kind: input, shape index: {}]   ;;  %s281_s2 = inlined_call_operand.vmem [shape: f32[1,128], index: 2, kind: input, shape index: {}]   ;;  %s282_s3 = inlined_call_operand.hbm [shape: f32[1,8,128], index: 3, kind: output, shape index: {}]  }
   0x1   :  { %9 = vsyncpa [#allocation4], 0  ;;  %s224_s12 = smov [#allocation2]   ;;  %s176_s16 = scalar_lea.hbm %s279_s0, 64 }
   0x2   :  { %s19_s13 = sshll.u32 %s224_s12, 4  ;;  %p177_p0 = scmp.ne.s32.totalorder %s279_s0, %s176_s16  ;;  %s20_s13 = int_to_ptr.vmem [resolvable:$true] %s19_s13 }
   0x3   :  { %p180_p1 = scmp.lt.u32.totalorder %s176_s16, %s279_s0 }
   0x5   :  { %p182_p2 = pnand %p180_p1, %p177_p0 }
   0x7   :  { %185 = shalt.err (!%p182_p2)
}
   0x8   :  { %s186_s21 = scalar_lea.vmem %s20_s13, 64  ;;  %p191_p4 = scmp.lt.s32.totalorder %s20_s13, %s20_s13 }
   0x9   :  { %p187_p3 = scmp.ne.s32.totalorder %s20_s13, %s186_s21  ;;  %p192_p5 = scmp.lt.s32.totalorder %s186_s21, %s186_s21 }
   0xb   :  { %p193_p6 = por %p192_p5, %p191_p4 }
   0xd   :  { %p194_p7 = pnand %p193_p6, %p187_p3 }
   0xf   :  { %197 = shalt.err (!%p194_p7)
}
  0x10   :  { %22 = dma.hbm_to_vmem [thread:$0]  %s279_s0, 64, %s20_s13, [#allocation3]  }
  0x11   :  { %220 = dma.done.wait [#allocation3], 64  }
  0x12   :  { %221 = vsyncadd [#allocation3], 4294967232  ;;  %vm69_vm0 = vcmask 1043456   ;;  %v59_v0 = vld [vmem:[#allocation2] sm:$0xf]  ;;  %v63_v9 = vlaneseq  ;;  %vm107_vm3 = vcmask 1040384  }
  0x13   :  { %v70_v1 = vsel %vm69_vm0, %v59_v0, -inf  ;;  %v164_v12 = vld [vmem:[%s280_s1] ss:$0 sm:$0xff]  ;;  %s225_s30 = smov [#allocation5]  }
  0x14   :  { %v71_v2 = vrot.slane %v70_v1, 4  ;;  %v91_v11 = vshrl.u32 %v63_v9, 7  ;;  %v61_v27 = vld [vmem:[%s281_s2] sm:$0x1]  ;;  %v64_v31 = vand.u32 127, %v63_v9  ;;  %s149_s4 = sshll.u32 %s225_s30, 4  ;;  %s150_s4 = int_to_ptr.vmem [resolvable:$true] %s149_s4 }
  0x15   :  { %v119_v29 = vsub.f32 %v59_v0, %v61_v27  ;;  %s198_s5 = scalar_lea.vmem %s150_s4, 128  ;;  %p203_p9 = scmp.lt.s32.totalorder %s150_s4, %s150_s4 }
  0x16   :  { %v72_v3 = vmax.f32 %v70_v1, %v71_v2  ;;  %vm96_vm1 = vcmp.eq.s32.totalorder %v91_v11, %v164_v12  ;;  %vm68_vm2 = vcmp.lt.s32.totalorder %v64_v31, 8  ;;  %p199_p8 = scmp.ne.s32.totalorder %s150_s4, %s198_s5  ;;  %p204_p10 = scmp.lt.s32.totalorder %s198_s5, %s198_s5 }
  0x17   :  { %v97_v13 = vsel %vm96_vm1, %v59_v0, 0.0  ;;  %v120_v35 = vmul.f32 %v119_v29, %v119_v29 }
  0x18   :  { %v73_v4 = vrot.slane %v72_v3, 2  ;;  %v98_v17 = vsel %vm69_vm0, %v97_v13, 0.0  ;;  %p205_p11 = por %p204_p10, %p203_p9 }
  0x19   :  { %v99_v19 = vrot.slane %v98_v17, 4  ;;  %v121_v38 = vsel %vm68_vm2, %v120_v35, 0.0 }
  0x1a   :  { %v74_v5 = vmax.f32 %v72_v3, %v73_v4  ;;  %v122_v40 = vsel %vm107_vm3, %v121_v38, 0.0  ;;  %p206_p12 = pnand %p205_p11, %p199_p8 }
  0x1b   :  { %v100_v22 = vadd.f32 %v99_v19, %v98_v17 }
  0x1c   :  { %v75_v6 = vrot.slane %v74_v5, 1 }
  0x1d   :  { %v101_v25 = vrot.slane %v100_v22, 2 }
  0x1e   :  { %v76_v7 = vmax.f32 %v74_v5, %v75_v6 }
  0x1f   :  { %v102_v26 = vadd.f32 %v101_v25, %v100_v22 }
  0x20   :  { %v77_v8 = vsub.f32 %v59_v0, %v76_v7 }
  0x21   :  { %v103_v28 = vrot.slane %v102_v26, 1 }
  0x22   :  { %v78_v10 = vmul.f32 1.442695, %v77_v8 }
  0x23   :  { %v104_v33 = vadd.f32 %v103_v28, %v102_v26 }
  0x24   :  { %172 = vpow2.f32 %v78_v10 }
  0x2e   :  { %v173_v14 = vpop.eup %172 }
  0x2f   :  { %v80_v15 = vsel %vm69_vm0, %v173_v14, 0.0 }
  0x30   :  { %v81_v16 = vrot.slane %v80_v15, 4 }
  0x32   :  { %v82_v18 = vadd.f32 %v81_v16, %v80_v15 }
  0x34   :  { %v83_v20 = vrot.slane %v82_v18, 2 }
  0x36   :  { %v84_v21 = vadd.f32 %v83_v20, %v82_v18 }
  0x38   :  { %v85_v23 = vrot.slane %v84_v21, 1 }
  0x3a   :  { %v86_v24 = vadd.f32 %v85_v23, %v84_v21 }
  0x3c   :  { %174 = vlog2.f32 %v86_v24 }
  0x46   :  { %v175_v30 = vpop.eup %174 }
  0x47   :  { %v88_v32 = vmul.f32 0.6931472, %v175_v30 }
  0x49   :  { %v89_v34 = vadd.f32 %v88_v32, %v76_v7 }
  0x4b   :  { %v105_v36 = vsub.f32 %v89_v34, %v104_v33 }
  0x4d   :  { %v106_v37 = vsel %vm68_vm2, %v105_v36, 0.0 }
  0x4e   :  { %v108_v39 = vsel %vm107_vm3, %v106_v37, 0.0 }
  0x4f   :  { %109 = vadd.xlane.f32.xlu0 %v108_v39 }
  0x53   :  { %123 = vadd.xlane.f32.xlu0 %v122_v40 }
  0xdc   :  { %v110_v41 = vpop.xlane.xlu0 %109 }
  0xdd   :  { %v111_v42 = vrot.slane %v110_v41, 4 }
  0xdf   :  { %v112_v43 = vadd.f32 %v111_v42, %v110_v41 }
  0xe0   :  { %v124_v44 = vpop.xlane.xlu0 %123 }
  0xe1   :  { %v113_v45 = vrot.slane %v112_v43, 2  ;;  %v125_v46 = vrot.slane %v124_v44, 4 }
  0xe3   :  { %v126_v47 = vadd.f32 %v125_v46, %v124_v44  ;;  %v114_v48 = vadd.f32 %v113_v45, %v112_v43 }
  0xe5   :  { %v127_v49 = vrot.slane %v126_v47, 2  ;;  %v115_v50 = vrot.slane %v114_v48, 1 }
  0xe7   :  { %v128_v51 = vadd.f32 %v127_v49, %v126_v47  ;;  %v116_v52 = vadd.f32 %v115_v50, %v114_v48 }
  0xe9   :  { %165 = vpush %v116_v52  ;;  %v129_v53 = vrot.slane %v128_v51, 1 }
  0xeb   :  { %v130_v54 = vadd.f32 %v129_v53, %v128_v51 }
  0xed   :  { %167 = vpush %v130_v54 }
 0x11a   :  { %s166_s2 = spop %165 }
 0x11b   :  { %s118_s26 = smul.f32 0.125, %s166_s2 }
 0x11e   :  { %s168_s27 = spop %167 }
 0x11f   :  { %s132_s28 = smul.f32 0.5, %s168_s27 }
 0x121   :  { %s139_s29 = sadd.f32 %s132_s28, %s118_s26 }
 0x123   :  { %v140_v55 = vstv %s139_s29 }
 0x124   :  { %142 = vst [vmem:[#allocation5] sm:$0xff] %v140_v55 }
 0x125   :  { %209 = shalt.err (!%p206_p12)
}
 0x126   :  { %s210_s8 = scalar_lea.hbm %s282_s3, 128 }
 0x127   :  { %p211_p13 = scmp.ne.s32.totalorder %s282_s3, %s210_s8  ;;  %p214_p0 = scmp.lt.u32.totalorder %s210_s8, %s282_s3 }
 0x129   :  { %p216_p1 = pnand %p214_p0, %p211_p13 }
 0x12b   :  { %219 = shalt.err (!%p216_p1)
}
 0x12c   :  { %152 = dma.vmem_to_hbm [thread:$0]  %s150_s4, 128, %s282_s3, [#allocation4]  }
 0x12d   :  { %222 = dma.done.wait [#allocation4], 128  }
 0x12e   :  { %223 = vsyncadd [#allocation4], 4294967168 }
 0x12f   :  { %156 = vsyncpa [#allocation3], 1 }
 0x130   :  { %157 = vsyncpa [#allocation4], 1 }

</bundles_post_ra>
